<compile_context>
chip_gen: v5e
topology: v5e:2x2
jax: 0.10.0
libtpu: 0.0.40
codegen_flags: <defaults>
</compile_context>

<pallas_src>
import jax
import jax.numpy as jnp
from jax.experimental import pallas as pl
from jax.experimental.pallas import tpu as pltpu


def _round_up(x: int, m: int) -> int:
    return (x + m - 1) // m * m


def _vmem_capacity_bytes() -> int:
    """Generation-aware VMEM capacity (128 MiB on v5e/v6e, 64 MiB/TC on v7x)."""
    try:
        return int(pltpu.get_tpu_info().vmem_capacity_bytes)
    except Exception:
        return 64 * 2 ** 20  # most conservative default across current chips


def _project_kernel(x_ref, wt_ref, xw_ref):
    # One-shot projection XW = X @ W.T (f32 accumulate, stored in the compute
    # dtype).  Hoisted out of the row-tiled kernel so it runs once, not once
    # per grid step.
    xw_ref[...] = jnp.dot(
        x_ref[...], wt_ref[...], preferred_element_type=jnp.float32
    ).astype(xw_ref.dtype)


def graph_unpool_kernel(a_ref, xw_ref, b_ref, o_ref):
    # TODO(synk): nn.Dropout(p=0.3) is training-only; the inference (identity)
    # path is implemented here.
    out = jnp.dot(a_ref[...], xw_ref[...], preferred_element_type=jnp.float32)
    o_ref[...] = (out + b_ref[...]).astype(o_ref.dtype)


def graph_unpool(A, X, idx, W, b, *, block_rows=512, compute_dtype=jnp.bfloat16):
    """GraphUnpool forward.

    A: (N, N) adjacency, X: (K, D) pooled features, idx: (K,) int32 *unique*
    node indices (graph top-k pooling guarantees uniqueness; duplicates would
    sum contributions instead of PyTorch's last-write-wins scatter),
    W: (D, D) torch Linear weight (out, in), b: (D,) bias.
    Returns (N, D) float32.
    """
    N = A.shape[0]
    K, D = X.shape
    out_dtype = jnp.float32  # match the f32 PyTorch module output

    # --- wrapper-side gather (cheap XLA op scheduled around the custom call).
    # This streams essentially all of A with a strided column gather; if A is
    # reused across calls, gather from a pre-transposed / pre-cast copy instead.
    A_g = jnp.take(A, idx, axis=1)  # (N, K) gathered adjacency columns

    # Padding.  Do NOT blindly pad tiny K to 128: the A tile's last block dim
    # equals the full (padded) array dim, which is legal for any size, and
    # 128-padding would inflate the dominant HBM stream by 128/K.
    K_p = _round_up(K, 128) if K >= 128 else _round_up(K, 8)
    D_p = _round_up(D, 128)

    cdt = jnp.dtype(compute_dtype)
    f32 = jnp.dtype(jnp.float32)

    # VMEM budget (generation-aware) -> derive the row tile size tm.
    # Budget assumes worst-case double-buffered residents so the fallback path
    # (no single-buffering support) also fits.
    resident_bytes = K_p * D_p * cdt.itemsize + D_p * f32.itemsize   # XW + bias
    bytes_per_row = 2 * K_p * cdt.itemsize + 2 * D_p * f32.itemsize  # A + out (x2 buf)
    budget = int(0.70 * _vmem_capacity_bytes())
    avail = budget - 2 * resident_bytes
    # TODO(synk): if the resident XW ever exceeds the VMEM budget (huge K*D),
    # add an inner "arbitrary" K grid axis with an f32 accumulator scratch.
    tm_cap = (avail // bytes_per_row) // 8 * 8 if avail > 8 * bytes_per_row else 8
    tm = max(8, min(_round_up(N, 8), _round_up(block_rows, 8), tm_cap))
    N_p = _round_up(N, tm)
    grid = (N_p // tm,)

    # Pad; cast the heavy streamed operand to the (bf16) compute dtype.  f32
    # accumulation happens in-kernel; bias add and output stay f32.
    X_p = jnp.pad(X.astype(jnp.float32), ((0, K_p - K), (0, D_p - D)))
    W_p = jnp.pad(W.T.astype(jnp.float32), ((0, D_p - D), (0, D_p - D)))
    b_p = jnp.pad(b.astype(jnp.float32).reshape(1, D), ((0, 0), (0, D_p - D)))
    A_c = jnp.pad(A_g, ((0, N_p - N), (0, K_p - K))).astype(compute_dtype)

    # Hoisted projection XW = X @ W.T (one-shot, whole arrays in VMEM).
    proj_bytes = (K_p * D_p + D_p * D_p) * f32.itemsize + K_p * D_p * cdt.itemsize
    XW = pl.pallas_call(
        _project_kernel,
        out_shape=jax.ShapeDtypeStruct((K_p, D_p), compute_dtype),
        compiler_params=pltpu.CompilerParams(
            vmem_limit_bytes=int(min(budget, max(2 * proj_bytes, 4 * 2 ** 20))),
        ),
    )(X_p, W_p)

    footprint = 2 * resident_bytes + tm * bytes_per_row
    vmem_limit = int(max(min(budget, max(2 * footprint, 4 * 2 ** 20)), footprint))

    cost = pl.CostEstimate(
        flops=2 * N_p * K_p * D_p,
        transcendentals=0,
        bytes_accessed=(
            N_p * K_p * cdt.itemsize      # streamed A[:, idx]
            + K_p * D_p * cdt.itemsize    # resident XW
            + D_p * f32.itemsize          # resident bias
            + N_p * D_p * f32.itemsize    # output
        ),
    )

    def _run(single_buffer_residents: bool):
        # Grid-invariant residents (XW, bias) never change across the grid, so
        # the second pipeline buffer is pure VMEM waste -> request Buffered(1).
        res_kw = (
            {"pipeline_mode": pl.Buffered(1)} if single_buffer_residents else {}
        )
        return pl.pallas_call(
            graph_unpool_kernel,
            out_shape=jax.ShapeDtypeStruct((N_p, D_p), out_dtype),
            grid_spec=pltpu.PrefetchScalarGridSpec(
                num_scalar_prefetch=0,
                grid=grid,
                in_specs=[
                    pl.BlockSpec((tm, K_p), lambda i: (i, 0)),              # A row tile
                    pl.BlockSpec((K_p, D_p), lambda i: (0, 0), **res_kw),   # XW resident
                    pl.BlockSpec((1, D_p), lambda i: (0, 0), **res_kw),     # bias resident
                ],
                out_specs=pl.BlockSpec((tm, D_p), lambda i: (i, 0)),
            ),
            compiler_params=pltpu.CompilerParams(
                dimension_semantics=("parallel",),
                vmem_limit_bytes=vmem_limit,
            ),
            cost_estimate=cost,
        )(A_c, XW, b_p)

    try:
        out_padded = _run(True)
    except Exception:
        # jax version without BlockSpec(pipeline_mode=...) support: fall back
        # to default double-buffering of the (small) grid-invariant residents.
        out_padded = _run(False)

    return out_padded[:N, :D]


if __name__ == "__main__":
    N = 16   # nodes in the unpooled graph (A.shape[0])
    K = 8    # pooled nodes (X.shape[0])
    D = 32   # in_dim

    key = jax.random.PRNGKey(0)
    k1, k2, k3, k4, k5 = jax.random.split(key, 5)

    A = jax.random.normal(k1, (N, N), jnp.float32)
    X = jax.random.normal(k2, (K, D), jnp.float32)
    idx = jax.random.permutation(k3, N)[:K].astype(jnp.int32)  # unique indices

    # Deterministic "Linear(in_dim, in_dim)" parameters (torch weight is (out, in)).
    bound = 1.0 / (D ** 0.5)
    W = jax.random.uniform(k4, (D, D), jnp.float32, -bound, bound)
    b = jax.random.uniform(k5, (D,), jnp.float32, -bound, bound)

    # Pure-JAX reference for the exact original forward semantics.
    new_X = jnp.zeros((N, D), jnp.float32).at[idx].set(X)
    ref = (A @ new_X) @ W.T + b

    # Default path: bf16 streams, f32 accumulation (tolerance at bf16 scale).
    out_bf16 = jax.block_until_ready(graph_unpool(A, X, idx, W, b))
    assert out_bf16.shape == (N, D) and out_bf16.dtype == jnp.float32
    assert jnp.allclose(out_bf16, ref, atol=1e-1, rtol=1e-1), "bf16 path mismatch"

    # Full-f32 path: tight check that the algebraic rewrite is exact.
    out_f32 = jax.block_until_ready(
        graph_unpool(A, X, idx, W, b, compute_dtype=jnp.float32)
    )
    assert out_f32.shape == (N, D) and out_f32.dtype == jnp.float32
    assert jnp.allclose(out_f32, ref, atol=1e-4, rtol=1e-4), "f32 path mismatch"

    print("KERNEL_OK")
</pallas_src>

<mosaic_0001>
module attributes {stable_mosaic.version = 11 : i64} {
  func.func @_project_kernel(%arg0: memref<8x128xf32, #tpu.memory_space<vmem>>, %arg1: memref<128x128xf32, #tpu.memory_space<vmem>>, %arg2: memref<8x128xbf16, #tpu.memory_space<vmem>>) attributes {dimension_semantics = [], scalar_prefetch = 0 : i64, scratch_operands = 0 : i64, tpu.core_type = #tpu.core_type<tc>} {
    %c0 = arith.constant 0 : index
    %c0_0 = arith.constant 0 : index
    %0 = vector.load %arg0[%c0, %c0_0] : memref<8x128xf32, #tpu.memory_space<vmem>>, vector<8x128xf32>
    %c0_1 = arith.constant 0 : index
    %c0_2 = arith.constant 0 : index
    %1 = vector.load %arg1[%c0_1, %c0_2] : memref<128x128xf32, #tpu.memory_space<vmem>>, vector<128x128xf32>
    %cst = arith.constant dense<0.000000e+00> : vector<8x128xf32>
    %2 = tpu.matmul %0, %1, %cst {dimension_numbers = #tpu.dot_dimension_numbers<[1], [0], [0], [1], [0, 0, 1, 1], [], []>} : vector<8x128xf32>, vector<128x128xf32>, vector<8x128xf32> -> vector<8x128xf32>
    %3 = arith.truncf %2 : vector<8x128xf32> to vector<8x128xbf16>
    %c0_3 = arith.constant 0 : index
    %c0_4 = arith.constant 0 : index
    %4 = vector.load %arg2[%c0_3, %c0_4] : memref<8x128xbf16, #tpu.memory_space<vmem>>, vector<8x128xbf16>
    tpu.vector_store %arg2[%c0_3, %c0_4], %3 {strides = array<i32>} : memref<8x128xbf16, #tpu.memory_space<vmem>>, vector<8x128xbf16>,
    return
  }
}

</mosaic_0001>

<bundles_post_ra>
// kernel: tpu_custom_call.1
= control target key start
LH: loop header
LB: loop body
LE: loop exit
PB: predicated region body
PF: predicated region fallthrough
CT: control target
= control target key end

     0   :  { %7 = vsyncpa [#allocation3], 0  ;;  %s211_s0 = inlined_call_operand.hbm [shape: f32[8,128], index: 0, kind: input, shape index: {}]   ;;  %s212_s1 = inlined_call_operand.hbm [shape: f32[128,128], index: 1, kind: input, shape index: {}]   ;;  %s213_s2 = inlined_call_operand.hbm [shape: bf16[8,128], index: 2, kind: output, shape index: {}]  }
   0x1   :  { %8 = vsyncpa [#allocation6], 0 }
   0x2   :  { %9 = vsyncpa [#allocation4], 0  ;;  %s15_s11 = sshll.u32 %s211_s0, 4  ;;  %s182_s12 = smov [#allocation2]   ;;  %s16_s11 = int_to_ptr.hbm [resolvable:$true] %s15_s11 }
   0x3   :  { %s17_s13 = sshll.u32 %s182_s12, 4  ;;  %s25_s16 = sshll.u32 %s212_s1, 4  ;;  %s18_s13 = int_to_ptr.vmem [resolvable:$true] %s17_s13  ;;  %s26_s16 = int_to_ptr.hbm [resolvable:$true] %s25_s16 }
   0x4   :  { %20 = dma.hbm_to_vmem [thread:$0]  %s16_s11, 128, %s18_s13, [#allocation3]  }
   0x5   :  { %s183_s17 = smov [#allocation5]   ;;  %s184_s19 = smov 128  }
   0x6   :  { %s27_s18 = sshll.u32 %s183_s17, 4  ;;  %s185_s20 = smov 8   ;;  %s28_s18 = int_to_ptr.vmem [resolvable:$true] %s27_s18 }
   0x7   :  { %33 = dma.hbm_to_vmem [thread:$0]  %s26_s16, 2048, %s28_s18, [#allocation6], %s184_s19, %s184_s19, %s185_s20  }
   0x8   :  { %176 = dma.done.wait [#allocation3], 128  }
   0x9   :  { %177 = vsyncadd [#allocation3], 4294967168 }
   0xa   :  { %178 = dma.done.wait [#allocation6], 2048  }
   0xb   :  { %179 = vsyncadd [#allocation6], 4294965248  ;;  %v58_v0 = vld [vmem:[#allocation5 + $0x78] sm:$0xff]  ;;  %v57_v1 = vld [vmem:[#allocation5 + $0x70] sm:$0xff]  ;;  %s186_s0 = smov [#allocation7]   ;;  %s88_s23 = sshll.u32 %s213_s2, 4  ;;  %s89_s23 = int_to_ptr.hbm [resolvable:$true] %s88_s23 }
   0xc   :  { %59 = vmatpush.msra.mxu0 %v58_v0  ;;  %v56_v2 = vld [vmem:[#allocation5 + $0x68] sm:$0xff]  ;;  %v55_v3 = vld [vmem:[#allocation5 + $0x60] sm:$0xff]  ;;  %v54_v4 = vld [vmem:[#allocation5 + $0x58] sm:$0xff]  ;;  %s86_s1 = sshll.u32 %s186_s0, 4  ;;  %s87_s1 = int_to_ptr.vmem [resolvable:$true] %s86_s1 }
   0xd   :  { %v53_v5 = vld [vmem:[#allocation5 + $0x50] sm:$0xff]  ;;  %v52_v6 = vld [vmem:[#allocation5 + $0x48] sm:$0xff]  ;;  %v51_v7 = vld [vmem:[#allocation5 + $0x40] sm:$0xff] }
   0xe   :  { %60 = vmatpush.msra.mxu0 %v57_v1  ;;  %v50_v8 = vld [vmem:[#allocation5 + $0x38] sm:$0xff]  ;;  %v49_v9 = vld [vmem:[#allocation5 + $0x30] sm:$0xff]  ;;  %v48_v10 = vld [vmem:[#allocation5 + $0x28] sm:$0xff] }
   0xf   :  { %v47_v11 = vld [vmem:[#allocation5 + $0x20] sm:$0xff]  ;;  %v46_v12 = vld [vmem:[#allocation5 + $0x18] sm:$0xff]  ;;  %v45_v13 = vld [vmem:[#allocation5 + $0x10] sm:$0xff] }
  0x10   :  { %61 = vmatpush.msra.mxu0 %v56_v2  ;;  %v44_v14 = vld [vmem:[#allocation5 + $0x8] sm:$0xff]  ;;  %v43_v15 = vld [vmem:[#allocation5] sm:$0xff]  ;;  %v42_v16 = vld [vmem:[#allocation2] sm:$0xff] }
  0x12   :  { %62 = vmatpush.msra.mxu0 %v55_v3 }
  0x14   :  { %63 = vmatpush.msra.mxu0 %v54_v4 }
  0x16   :  { %64 = vmatpush.msra.mxu0 %v53_v5 }
  0x18   :  { %65 = vmatpush.msra.mxu0 %v52_v6 }
  0x1a   :  { %66 = vmatpush.msra.mxu0 %v51_v7 }
  0x1c   :  { %67 = vmatpush.msra.mxu0 %v50_v8 }
  0x1e   :  { %68 = vmatpush.msra.mxu0 %v49_v9 }
  0x20   :  { %69 = vmatpush.msra.mxu0 %v48_v10 }
  0x22   :  { %70 = vmatpush.msra.mxu0 %v47_v11 }
  0x24   :  { %71 = vmatpush.msra.mxu0 %v46_v12 }
  0x26   :  { %72 = vmatpush.msra.mxu0 %v45_v13 }
  0x28   :  { %73 = vmatpush.msra.mxu0 %v44_v14 }
  0x2a   :  { %74 = vmatpush.msra.mxu0 %v43_v15 }
  0x2b   :  { %75 = vmatmul.f32.vlgmr.msra.gmra.mxu0 %v42_v16 }
  0xa8   :  { %v76_v17 = vpop.f32.mrf.mxu0 }
  0xa9   :  { %v79_v18 = vpack.c.bf16 %v76_v17, %v76_v17 }
  0xab   :  { %80 = vst [vmem:[#allocation7] sm:$0xf] %v79_v18 }
  0xac   :  { %91 = dma.vmem_to_hbm [thread:$0]  %s87_s1, 64, %s89_s23, [#allocation4]  }
  0xad   :  { %180 = dma.done.wait [#allocation4], 64  }
  0xae   :  { %181 = vsyncadd [#allocation4], 4294967232 }
  0xaf   :  { %96 = vsyncpa [#allocation3], 1 }
  0xb0   :  { %97 = vsyncpa [#allocation6], 1 }
  0xb1   :  { %98 = vsyncpa [#allocation4], 1 }

</bundles_post_ra>
